<compile_context>
chip_gen: v6e
topology: v6e:2x2x1
jax: 0.10.0
libtpu: 0.0.40
codegen_flags: <defaults>
</compile_context>

<pallas_src>
import math

import jax
import jax.numpy as jnp
from jax.experimental import pallas as pl
from jax.experimental.pallas import tpu as pltpu


# ---------------------------------------------------------------------------
# Pallas kernels
# ---------------------------------------------------------------------------
def _project_kernel(v_ref, x_ref, ct2_ref, w3_ref, acck_ref, p_acc):
    # layout: v:[tn,k]  x:[tn,cin]  ct2:[k,d] (pre-scaled by 2)  w3:[d,cin,out]
    #         acck (output, resident): [k,out]   p_acc scratch: [k,cin]
    @pl.when(pl.program_id(0) == 0)
    def _():
        p_acc[...] = jnp.zeros_like(p_acc)

    # p += V_tile^T @ x_tile   (contraction over the node-tile axis)
    p_acc[...] += jax.lax.dot_general(
        v_ref[...], x_ref[...], (((0,), (0,)), ((), ())),
        preferred_element_type=jnp.float32)

    @pl.when(pl.program_id(0) == pl.num_programs(0) - 1)
    def _():
        p = p_acc[...]                                   # (k, cin)
        ct2 = ct2_ref[...]                               # (k, d), 2x pre-folded
        w3 = w3_ref[...]                                 # (d, cin, out)
        d = ct2.shape[1]
        # diag(2*Re(c_j)) @ p @ W3_j, summed over j — d is a tiny static int,
        # statically unrolled so the LLO scheduler sees the whole epilogue.
        acc = jnp.dot(ct2[:, 0:1] * p, w3[0],
                      preferred_element_type=jnp.float32)
        for j in range(1, d):
            acc = acc + jnp.dot(ct2[:, j:j + 1] * p, w3[j],
                                preferred_element_type=jnp.float32)
        acck_ref[...] = acc


def _apply_relu_kernel(v_ref, x_ref, acck_ref, wdc_ref, b_ref, o_ref):
    # layout: v:[tn,k]  x:[tn,cin]  acck:[k,out]  wdc:[cin,out]  b:[1,out]
    out = (jnp.dot(x_ref[...], wdc_ref[...], preferred_element_type=jnp.float32)
           + jnp.dot(v_ref[...], acck_ref[...], preferred_element_type=jnp.float32)
           + b_ref[...])
    o_ref[...] = jnp.maximum(out, 0.0)                   # fused bias + ReLU


# ---------------------------------------------------------------------------
# Wrappers
# ---------------------------------------------------------------------------
def _row_tile(n):
    """Row-tile size (multiple of 8, capped at 512) and padded node count."""
    n8 = -(-n // 8) * 8
    tn = min(512, n8)
    n_pad = -(-n // tn) * tn
    return tn, n_pad


def cayley_conv_relu(v_pad, x_pad, ct2, w3, wdc, b_row, tn):
    """One fused CayleyConvLanczos + ReLU layer.

    v_pad:[n_pad,k] x_pad:[n_pad,cin] ct2:[k,d] w3:[d,cin,out]
    wdc:[cin,out] b_row:[1,out]  ->  [n_pad,out]  (padded rows = relu(b))
    """
    n_pad, k = v_pad.shape
    cin = x_pad.shape[1]
    d, _, out_ch = w3.shape
    grid = (n_pad // tn,)

    acck = pl.pallas_call(
        _project_kernel,
        out_shape=jax.ShapeDtypeStruct((k, out_ch), jnp.float32),
        grid=grid,
        in_specs=[
            pl.BlockSpec((tn, k), lambda i: (i, 0)),
            pl.BlockSpec((tn, cin), lambda i: (i, 0)),
            pl.BlockSpec((k, d), lambda i: (0, 0)),
            pl.BlockSpec((d, cin, out_ch), lambda i: (0, 0, 0)),
        ],
        out_specs=pl.BlockSpec((k, out_ch), lambda i: (0, 0)),
        scratch_shapes=[pltpu.VMEM((k, cin), jnp.float32)],
        compiler_params=pltpu.CompilerParams(
            dimension_semantics=("arbitrary",)),         # reduction over node tiles
    )(v_pad, x_pad, ct2, w3)

    return pl.pallas_call(
        _apply_relu_kernel,
        out_shape=jax.ShapeDtypeStruct((n_pad, out_ch), jnp.float32),
        grid=grid,
        in_specs=[
            pl.BlockSpec((tn, k), lambda i: (i, 0)),
            pl.BlockSpec((tn, cin), lambda i: (i, 0)),
            pl.BlockSpec((k, out_ch), lambda i: (0, 0)),
            pl.BlockSpec((cin, out_ch), lambda i: (0, 0)),
            pl.BlockSpec((1, out_ch), lambda i: (0, 0)),
        ],
        out_specs=pl.BlockSpec((tn, out_ch), lambda i: (i, 0)),
        compiler_params=pltpu.CompilerParams(
            dimension_semantics=("parallel",)),          # independent row tiles
    )(v_pad, x_pad, acck, wdc, b_row)


# ---------------------------------------------------------------------------
# Deterministic parameter init (mirrors the PyTorch __init__ shapes)
# ---------------------------------------------------------------------------
def _uniform(key, shape, bound):
    return jax.random.uniform(key, shape, jnp.float32, -bound, bound)


def init_params(key, n_conv, r, d, feature_dim, hidden_dim, output_dim):
    params = {"convs": []}
    for i in range(n_conv):
        in_ch = feature_dim if i == 0 else hidden_dim
        key, k1, k2, k3, k4, k5 = jax.random.split(key, 6)
        params["convs"].append({
            "h": jnp.float32(0.5),
            "alpha": jnp.float32(0.1),
            # real_linear: nn.Linear(1, d, bias=False)      -> (d, 1)
            "w_real": _uniform(k1, (d, 1), 1.0),
            # complex_linear: ComplexLinear(r, d, no bias)  -> cfloat (d, r)
            "w_cplx_re": _uniform(k2, (d, r), 1.0 / math.sqrt(r)),
            "w_cplx_im": _uniform(k3, (d, r), 1.0 / math.sqrt(r)),
            # signal_linear: nn.Linear(in_ch*d, hidden_dim)
            "w_sig": _uniform(k4, (hidden_dim, in_ch * d),
                              1.0 / math.sqrt(in_ch * d)),
            "b_sig": _uniform(k5, (hidden_dim,), 1.0 / math.sqrt(in_ch * d)),
        })
    key, kp, kl1, kl2 = jax.random.split(key, 4)
    params["pool_w"] = _uniform(kp, (1, hidden_dim), 1.0 / math.sqrt(hidden_dim))
    params["lin_w"] = _uniform(kl1, (output_dim, hidden_dim),
                               1.0 / math.sqrt(hidden_dim))
    params["lin_b"] = _uniform(kl2, (output_dim,), 1.0 / math.sqrt(hidden_dim))
    return params


# ---------------------------------------------------------------------------
# Forward pass (glue in plain JAX, hot path in Pallas)
# ---------------------------------------------------------------------------
EIG_RATIO = 0.2
POOL_RATIO = 0.9


def cayley_net_forward(params, x, edge_index, batch, r, d):
    n = x.shape[0]
    k = max(int(n * EIG_RATIO), 6)

    # --- graph Laplacian L = D - A (get_laplacian, normalization=None) ------
    row, col = edge_index[0], edge_index[1]
    ew = jnp.ones((edge_index.shape[1],), jnp.float32)
    A = jnp.zeros((n, n), jnp.float32).at[row, col].add(ew)
    deg = jnp.zeros((n,), jnp.float32).at[row].add(ew)
    L = jnp.diag(deg) - A

    # --- eigen-decomposition -------------------------------------------------
    # TODO(synk): reference uses scipy eigsh (Lanczos, k largest-magnitude);
    # here dense jnp.linalg.eigh of the PSD Laplacian, keep the k largest pairs.
    vals, vecs = jnp.linalg.eigh(L)
    eig_vals = vals[-k:]
    eig_vecs = vecs[:, -k:].astype(jnp.float32)

    # --- pad node dim once (zero rows contribute nothing to V^T x) ----------
    tn, n_pad = _row_tile(n)
    v_pad = jnp.zeros((n_pad, k), jnp.float32).at[:n].set(eig_vecs)
    x_pad = jnp.zeros((n_pad, x.shape[1]), jnp.float32).at[:n].set(
        x.astype(jnp.float32))

    for conv in params["convs"]:
        h, alpha = conv["h"], conv["alpha"]
        # eigen Cayley filter: (h*lam - alpha*i) / (h*lam - alpha*i)  (== 1,
        # kept identical to the reference module)
        numer = h * eig_vals.astype(jnp.complex64) - alpha * 1j
        eigen_filter = numer / numer
        poly = jnp.stack([eigen_filter ** j for j in range(1, r + 1)])  # (r,k)
        w_cplx = conv["w_cplx_re"] + 1j * conv["w_cplx_im"]             # (d,r)
        d_filters = poly.T @ w_cplx.T                                   # (k,d)
        # replicate torch.sparse_coo_tensor(dia_idx, d_filters.view(-1)) order;
        # V is real so only Re(c) survives 2*Re(V diag(c) V^T)
        c_real = jnp.real(jnp.reshape(d_filters, (d, k))).astype(jnp.float32)
        ct2 = 2.0 * c_real.T                                            # (k,d)
        in_ch = x_pad.shape[1]
        w3 = conv["w_sig"].T.reshape(d, in_ch, -1)                      # (d,cin,H)
        # real_filter diag is constant per filter (real_linear(ones)); fold the
        # d scalars straight into one (cin,H) weight slab:  x @ wdc
        wdc = jnp.einsum("d,dco->co", conv["w_real"][:, 0], w3)
        b_row = conv["b_sig"][None, :]                                  # (1,H)
        x_pad = cayley_conv_relu(v_pad, x_pad, ct2, w3, wdc, b_row, tn)

    x = x_pad[:n]

    # --- TopKPooling(hidden_dim, ratio=0.9) ----------------------------------
    # TODO(synk): sort-based top-k node selection has no clean Pallas
    # equivalent; done in plain JAX (single-graph batch).
    w = params["pool_w"]
    score = jnp.tanh((x * w).sum(axis=-1) / jnp.linalg.norm(w))
    k_pool = int(math.ceil(POOL_RATIO * n))
    perm = jnp.argsort(-score)[:k_pool]
    x = x[perm] * score[perm][:, None]

    # --- global_mean_pool (single graph => plain mean) ------------------------
    pooled = jnp.mean(x, axis=0, keepdims=True)                        # (1, H)

    # --- F.dropout(p=0.2) in eval mode is identity -----------------------------
    # --- classifier: (1,H)x(H,out) is launch/DMA-bound as a kernel -> plain jnp
    return pooled @ params["lin_w"].T + params["lin_b"][None, :]


if __name__ == "__main__":
    N_CONV, R, K_HOPS = 2, 3, 3          # n_conv, r, K (= d per conv)
    FEAT, HID, OUT = 4, 8, 3             # feature_dim, hidden_dim, output_dim
    N_NODES = 16

    key = jax.random.PRNGKey(0)
    key, kx, kp = jax.random.split(key, 3)
    x = jax.random.normal(kx, (N_NODES, FEAT), jnp.float32)
    # deterministic ring graph with both edge directions
    src = jnp.arange(N_NODES, dtype=jnp.int32)
    dst = (src + 1) % N_NODES
    edge_index = jnp.concatenate(
        [jnp.stack([src, dst]), jnp.stack([dst, src])], axis=1)       # (2, 2N)
    batch = jnp.zeros((N_NODES,), jnp.int32)

    params = init_params(kp, N_CONV, R, K_HOPS, FEAT, HID, OUT)
    out = cayley_net_forward(params, x, edge_index, batch, R, K_HOPS)
    jax.block_until_ready(out)
    assert out.shape == (1, OUT) and out.dtype == jnp.float32
    print("KERNEL_OK")
</pallas_src>

<mosaic_0001>
module attributes {stable_mosaic.version = 11 : i64} {
  func.func @_project_kernel(%arg0: i32, %arg1: memref<16x6xf32, #tpu.memory_space<vmem>>, %arg2: memref<16x4xf32, #tpu.memory_space<vmem>>, %arg3: memref<6x3xf32, #tpu.memory_space<vmem>>, %arg4: memref<3x4x8xf32, #tpu.memory_space<vmem>>, %arg5: memref<6x8xf32, #tpu.memory_space<vmem>>, %arg6: memref<6x4xf32, #tpu.memory_space<vmem>>) attributes {dimension_semantics = [#tpu.dimension_semantics<arbitrary>], iteration_bounds = array<i64: 1>, scalar_prefetch = 0 : i64, scratch_operands = 1 : i64, tpu.core_type = #tpu.core_type<tc>, window_params = [{transform_indices = @transform_0, window_bounds = array<i64: 16, 6>}, {transform_indices = @transform_1, window_bounds = array<i64: 16, 4>}, {pipeline_mode = #tpu.pipeline_mode<synchronous>, transform_indices = @transform_2, window_bounds = array<i64: 6, 3>}, {pipeline_mode = #tpu.pipeline_mode<synchronous>, transform_indices = @transform_3, window_bounds = array<i64: 3, 4, 8>}, {pipeline_mode = #tpu.pipeline_mode<synchronous>, transform_indices = @transform_4, window_bounds = array<i64: 6, 8>}]} {
    %c0_i32 = arith.constant 0 : i32
    %0 = arith.cmpi eq, %arg0, %c0_i32 : i32
    %1 = arith.extui %0 : i1 to i32
    %c0_i32_0 = arith.constant 0 : i32
    %2 = arith.cmpi ne, %1, %c0_i32_0 : i32
    scf.if %2 {
      %cst_10 = arith.constant 0.000000e+00 : f32
      %12 = vector.broadcast %cst_10 : f32 to vector<6x4xf32>
      %c0_11 = arith.constant 0 : index
      %c0_12 = arith.constant 0 : index
      %13 = vector.load %arg6[%c0_11, %c0_12] : memref<6x4xf32, #tpu.memory_space<vmem>>, vector<6x4xf32>
      tpu.vector_store %arg6[%c0_11, %c0_12], %12 {strides = array<i32>} : memref<6x4xf32, #tpu.memory_space<vmem>>, vector<6x4xf32>,
    } else {
    }
    %c0 = arith.constant 0 : index
    %c0_1 = arith.constant 0 : index
    %3 = vector.load %arg6[%c0, %c0_1] : memref<6x4xf32, #tpu.memory_space<vmem>>, vector<6x4xf32>
    %c0_2 = arith.constant 0 : index
    %c0_3 = arith.constant 0 : index
    %4 = vector.load %arg1[%c0_2, %c0_3] : memref<16x6xf32, #tpu.memory_space<vmem>>, vector<16x6xf32>
    %c0_4 = arith.constant 0 : index
    %c0_5 = arith.constant 0 : index
    %5 = vector.load %arg2[%c0_4, %c0_5] : memref<16x4xf32, #tpu.memory_space<vmem>>, vector<16x4xf32>
    %cst = arith.constant dense<0.000000e+00> : vector<6x4xf32>
    %6 = tpu.matmul %4, %5, %cst {dimension_numbers = #tpu.dot_dimension_numbers<[0], [0], [1], [1], [0, 1, 1, 1], [], []>} : vector<16x6xf32>, vector<16x4xf32>, vector<6x4xf32> -> vector<6x4xf32>
    %7 = arith.addf %3, %6 : vector<6x4xf32>
    %c0_6 = arith.constant 0 : index
    %c0_7 = arith.constant 0 : index
    %8 = vector.load %arg6[%c0_6, %c0_7] : memref<6x4xf32, #tpu.memory_space<vmem>>, vector<6x4xf32>
    tpu.vector_store %arg6[%c0_6, %c0_7], %7 {strides = array<i32>} : memref<6x4xf32, #tpu.memory_space<vmem>>, vector<6x4xf32>,
    %c0_i32_8 = arith.constant 0 : i32
    %9 = arith.cmpi eq, %arg0, %c0_i32_8 : i32
    %10 = arith.extui %9 : i1 to i32
    %c0_i32_9 = arith.constant 0 : i32
    %11 = arith.cmpi ne, %10, %c0_i32_9 : i32
    scf.if %11 {
      %c0_10 = arith.constant 0 : index
      %c0_11 = arith.constant 0 : index
      %12 = vector.load %arg6[%c0_10, %c0_11] : memref<6x4xf32, #tpu.memory_space<vmem>>, vector<6x4xf32>
      %c0_12 = arith.constant 0 : index
      %c0_13 = arith.constant 0 : index
      %13 = vector.load %arg3[%c0_12, %c0_13] : memref<6x3xf32, #tpu.memory_space<vmem>>, vector<6x3xf32>
      %c0_14 = arith.constant 0 : index
      %c0_15 = arith.constant 0 : index
      %c0_16 = arith.constant 0 : index
      %14 = vector.load %arg4[%c0_14, %c0_15, %c0_16] : memref<3x4x8xf32, #tpu.memory_space<vmem>>, vector<3x4x8xf32>
      %15 = vector.extract_strided_slice %13 {offsets = [0, 0], sizes = [6, 1], strides = [1, 1]} : vector<6x3xf32> to vector<6x1xf32>
      %16 = vector.broadcast %15 : vector<6x1xf32> to vector<6x4xf32>
      %17 = arith.mulf %16, %12 : vector<6x4xf32>
      %18 = vector.extract_strided_slice %14 {offsets = [0, 0, 0], sizes = [1, 4, 8], strides = [1, 1, 1]} : vector<3x4x8xf32> to vector<1x4x8xf32>
      %19 = vector.shape_cast %18 : vector<1x4x8xf32> to vector<4x8xf32>
      %cst_17 = arith.constant dense<0.000000e+00> : vector<6x8xf32>
      %20 = tpu.matmul %17, %19, %cst_17 {dimension_numbers = #tpu.dot_dimension_numbers<[1], [0], [0], [1], [0, 0, 1, 1], [], []>} : vector<6x4xf32>, vector<4x8xf32>, vector<6x8xf32> -> vector<6x8xf32>
      %21 = vector.extract_strided_slice %13 {offsets = [0, 1], sizes = [6, 1], strides = [1, 1]} : vector<6x3xf32> to vector<6x1xf32>
      %22 = vector.broadcast %21 : vector<6x1xf32> to vector<6x4xf32>
      %23 = arith.mulf %22, %12 : vector<6x4xf32>
      %24 = vector.extract_strided_slice %14 {offsets = [1, 0, 0], sizes = [1, 4, 8], strides = [1, 1, 1]} : vector<3x4x8xf32> to vector<1x4x8xf32>
      %25 = vector.shape_cast %24 : vector<1x4x8xf32> to vector<4x8xf32>
      %cst_18 = arith.constant dense<0.000000e+00> : vector<6x8xf32>
      %26 = tpu.matmul %23, %25, %cst_18 {dimension_numbers = #tpu.dot_dimension_numbers<[1], [0], [0], [1], [0, 0, 1, 1], [], []>} : vector<6x4xf32>, vector<4x8xf32>, vector<6x8xf32> -> vector<6x8xf32>
      %27 = arith.addf %20, %26 : vector<6x8xf32>
      %28 = vector.extract_strided_slice %13 {offsets = [0, 2], sizes = [6, 1], strides = [1, 1]} : vector<6x3xf32> to vector<6x1xf32>
      %29 = vector.broadcast %28 : vector<6x1xf32> to vector<6x4xf32>
      %30 = arith.mulf %29, %12 : vector<6x4xf32>
      %31 = vector.extract_strided_slice %14 {offsets = [2, 0, 0], sizes = [1, 4, 8], strides = [1, 1, 1]} : vector<3x4x8xf32> to vector<1x4x8xf32>
      %32 = vector.shape_cast %31 : vector<1x4x8xf32> to vector<4x8xf32>
      %cst_19 = arith.constant dense<0.000000e+00> : vector<6x8xf32>
      %33 = tpu.matmul %30, %32, %cst_19 {dimension_numbers = #tpu.dot_dimension_numbers<[1], [0], [0], [1], [0, 0, 1, 1], [], []>} : vector<6x4xf32>, vector<4x8xf32>, vector<6x8xf32> -> vector<6x8xf32>
      %34 = arith.addf %27, %33 : vector<6x8xf32>
      %c0_20 = arith.constant 0 : index
      %c0_21 = arith.constant 0 : index
      %35 = vector.load %arg5[%c0_20, %c0_21] : memref<6x8xf32, #tpu.memory_space<vmem>>, vector<6x8xf32>
      tpu.vector_store %arg5[%c0_20, %c0_21], %34 {strides = array<i32>} : memref<6x8xf32, #tpu.memory_space<vmem>>, vector<6x8xf32>,
    } else {
    }
    return
  }
  func.func @transform_0(%arg0: i32) -> (i32, i32) {
    %c0_i32 = arith.constant 0 : i32
    %c0_i32_0 = arith.constant 0 : i32
    return %arg0, %c0_i32 : i32, i32
  }
  func.func @transform_1(%arg0: i32) -> (i32, i32) {
    %c0_i32 = arith.constant 0 : i32
    %c0_i32_0 = arith.constant 0 : i32
    return %arg0, %c0_i32 : i32, i32
  }
  func.func @transform_2(%arg0: i32) -> (i32, i32) {
    %c0_i32 = arith.constant 0 : i32
    %c0_i32_0 = arith.constant 0 : i32
    %c0_i32_1 = arith.constant 0 : i32
    return %c0_i32, %c0_i32_0 : i32, i32
  }
  func.func @transform_3(%arg0: i32) -> (i32, i32, i32) {
    %c0_i32 = arith.constant 0 : i32
    %c0_i32_0 = arith.constant 0 : i32
    %c0_i32_1 = arith.constant 0 : i32
    %c0_i32_2 = arith.constant 0 : i32
    return %c0_i32, %c0_i32_0, %c0_i32_1 : i32, i32, i32
  }
  func.func @transform_4(%arg0: i32) -> (i32, i32) {
    %c0_i32 = arith.constant 0 : i32
    %c0_i32_0 = arith.constant 0 : i32
    %c0_i32_1 = arith.constant 0 : i32
    return %c0_i32, %c0_i32_0 : i32, i32
  }
}

</mosaic_0001>

<bundles_post_ra>
// kernel: tpu_custom_call.1
= control target key start
LH: loop header
LB: loop body
LE: loop exit
PB: predicated region body
PF: predicated region fallthrough
CT: control target
= control target key end

     0   :  { %v478_v2 = vmov 0.0   ;;  %vm479_vm0 = vmmov 0   ;;  %vm22_vm1 = vcmask 29696   ;;  %s545_s0 = inlined_call_operand.vmem [shape: f32[16,6], index: 0, kind: input, shape index: {}]   ;;  %s546_s1 = inlined_call_operand.vmem [shape: f32[16,4], index: 1, kind: input, shape index: {}]   ;;  %s547_s2 = inlined_call_operand.vmem [shape: f32[6,3], index: 2, kind: input, shape index: {}]   ;;  %s548_s3 = inlined_call_operand.vmem [shape: f32[3,4,8], index: 3, kind: input, shape index: {}]   ;;  %s549_s4 = inlined_call_operand.hbm [shape: f32[6,8], index: 4, kind: output, shape index: {}]  }
   0x1   :  { %v25_v0 = vld [vmem:[%s545_s0] sm:$0xff]  ;;  %v28_v1 = vld [vmem:[%s546_s1 + $0x8] sm:$0xff]  ;;  %425 = vmatprep.subr.mxu0 %v478_v2  ;;  %429 = vmatprep.mubr.msk.f32.mxu0 %vm479_vm0, %v478_v2 }
   0x2   :  { %29 = vxpose.xlu0.b32.start [1/2] (short) (narrow) %v25_v0, 8  ;;  %v27_v3 = vld [vmem:[%s546_s1] sm:$0xff]  ;;  %v26_v5 = vld [vmem:[%s545_s0 + $0x8] sm:$0xff]  ;;  %426 = vmatpush3.msra.mxu0 %v28_v1 }
   0x3   :  { %v142_v4 = vld [vmem:[%s547_s2] sm:$0x3f] }
   0x4   :  { %9 = vsyncpa [#allocation4], 0  ;;  %427 = vmatprep.subr.mxu0 %v478_v2  ;;  %v480_v6 = vmov 1   ;;  %23 = vst.msk [vmem:[#allocation2] sm:$0x3f] %vm22_vm1, %v478_v2  ;;  %432 = vmatprep.subr.mxu1 %v478_v2  ;;  %v481_v7 = vmov 0  }
   0x5   :  { %453 = vset.pattern.permute.xlu1 %v480_v6  ;;  %428 = vmatpush3.msra.mxu0 %v27_v3  ;;  %v482_v8 = vmov 2   ;;  %vm61_vm2 = vcmask 130048   ;;  %v144_v10 = vld [vmem:[%s548_s3 + $0x4] sm:$0xf]  ;;  %vm161_vm3 = vcmask 1043456   ;;  %vm157_vm4 = vcmask 31744  }
   0x6   :  { %153 = vperm.xlu1 %453, %v142_v4   ;;  %30 = vxpose.xlu0.b32.end [2/2] (short) (narrow) %v26_v5, 8  ;;  %v145_v11 = vld [vmem:[%s548_s3 + $0x8] sm:$0xf]  ;;  %v143_v21 = vld [vmem:[%s548_s3] sm:$0xf]  ;;  %s483_s28 = smov [#allocation3]  }
   0x7   :  { %442 = vmatprep.subr.mxu0 %v478_v2  ;;  %434 = vmatprep.mubr.msk.f32.mxu1 %vm479_vm0, %v478_v2  ;;  %s401_s29 = sshll.u32 %s483_s28, 4  ;;  %vm393_vm5 = vcmask 62464   ;;  %s402_s29 = int_to_ptr.vmem [resolvable:$true] %s401_s29 }
   0x8   :  { %433 = vmatpush3.msk.msra.mxu1 %vm161_vm3, %v144_v10  ;;  %s456_s3 = scalar_lea.vmem %s402_s29, 128  ;;  %p461_p1 = scmp.lt.s32.totalorder %s402_s29, %s402_s29 }
   0x9   :  { %437 = vmatprep.subr.mxu1 %v478_v2  ;;  %p457_p0 = scmp.ne.s32.totalorder %s402_s29, %s456_s3  ;;  %p462_p2 = scmp.lt.s32.totalorder %s456_s3, %s456_s3 }
   0xa   :  { %454 = vset.pattern.permute.xlu1 %v481_v7 }
   0xb   :  { %148 = vperm.xlu1 %454, %v142_v4   ;;  %v24_v12 = vld [vmem:[#allocation2] sm:$0x3f]  ;;  %p463_p3 = por %p462_p2, %p461_p1 }
   0xd   :  { %p464_p4 = pnand %p463_p3, %p457_p0 }
  0x2f   :  { %455 = vset.pattern.permute.xlu0 %v482_v8 }
  0x30   :  { %312 = vperm.xlu0 %455, %v142_v4  }
  0x7e   :  { %v45_v9 = vpop.trf.xlu0 }
  0x7f   :  { %430 = vmatmul.mubr.msk.f32.vlgmr.msra.gmra.mxu0 %vm61_vm2, %v45_v9 }
  0x80   :  { %444 = vmatprep.mubr.msk.f32.mxu0 %vm479_vm0, %v478_v2  ;;  %443 = vmatpush3.msk.msra.mxu0 %vm161_vm3, %v145_v11 }
  0x81   :  { %v154_v16 = vpop.permute.xlu1 %153 }
  0x86   :  { %v149_v22 = vpop.permute.xlu1 %148 }
  0xab   :  { %v313_v17 = vpop.permute.xlu0 %312 }
 0x13f   :  { %v131_v13 = vpop.f32.mrf.mxu0 }
 0x140   :  { %v135_v14 = vadd.f32 %v131_v13, %v24_v12 }
 0x141   :  { %v431_v15 = vpop.f32.mrf.mxu0 }
 0x142   :  { %137 = vst.msk [vmem:[#allocation2] sm:$0x3f] %vm22_vm1, %v135_v14 }
 0x149   :  { %v141_v18 = vld [vmem:[#allocation2] sm:$0x3f] }
 0x14a   :  { %v156_v19 = vmul.f32 %v154_v16, %v141_v18  ;;  %v315_v20 = vmul.f32 %v313_v17, %v141_v18  ;;  %v151_v23 = vmul.f32 %v149_v22, %v141_v18 }
 0x14c   :  { %435 = vmatmul.mubr.msk.f32.vlgmr.msra.gmra.mxu1 %vm157_vm4, %v156_v19  ;;  %445 = vmatmul.mubr.msk.f32.vlgmr.msra.gmra.mxu0 %vm157_vm4, %v315_v20 }
 0x14d   :  { %438 = vmatpush3.msk.msra.mxu1 %vm161_vm3, %v143_v21  ;;  %439 = vmatprep.mubr.msk.f32.mxu1 %vm479_vm0, %v478_v2 }
 0x150   :  { %440 = vmatmul.mubr.msk.f32.vlgmr.msra.gmra.mxu1 %vm157_vm4, %v151_v23 }
 0x20c   :  { %v231_v24 = vpop.f32.mrf.mxu1  ;;  %v388_v25 = vpop.f32.mrf.mxu0 }
 0x20e   :  { %v436_v26 = vpop.f32.mrf.mxu1  ;;  %v446_v27 = vpop.f32.mrf.mxu0 }
 0x210   :  { %v307_v28 = vpop.f32.mrf.mxu1 }
 0x211   :  { %v308_v29 = vadd.f32 %v307_v28, %v231_v24 }
 0x212   :  { %v441_v30 = vpop.f32.mrf.mxu1 }
 0x213   :  { %v392_v31 = vadd.f32 %v388_v25, %v308_v29 }
 0x215   :  { %394 = vst.msk [vmem:[#allocation3] sm:$0x3f] %vm393_vm5, %v392_v31 }
 0x216   :  { %467 = shalt.err (!%p464_p4)
}
 0x217   :  { %404 = dma.vmem_to_hbm [thread:$0]  %s402_s29, 128, %s549_s4, [#allocation4]  }
 0x218   :  { %476 = dma.done.wait [#allocation4], 128  }
 0x219   :  { %477 = vsyncadd [#allocation4], 4294967168 }
 0x21a   :  { %408 = vsyncpa [#allocation4], 1 }

</bundles_post_ra>
